<compile_context>
chip_gen: v6e
topology: v6e:2x2x1
jax: 0.10.0
libtpu: 0.0.40
codegen_flags: <defaults>
</compile_context>

<pallas_src>
from functools import partial

import numpy as np
import jax
import jax.numpy as jnp
from jax import lax
from jax.experimental import pallas as pl
from jax.experimental.pallas import tpu as pltpu


# ----------------------------------------------------------------------------
# Kernel: one (batch, H-tile) grid step.
#   x_ref    : (1, Cin, M)     flattened NCHW tile, M = TH*W (lane-dense)
#   halo_ref : (1, 2, Cin, W)  [row above tile, row below tile]   (only if halo)
#   w_ref    : (Cout, 5*Cin)   fused taps [top,left,centre',right,bottom] (fuse)
#              (5, Cout, Cin)  per-tap weights                       (not fuse)
#   o_ref    : (1, Cout, M)    output tile (already NCHW-flattened)
# ----------------------------------------------------------------------------
def _cross_conv_kernel(*refs, W, has_halo, fuse):
    if has_halo:
        x_ref, halo_ref, w_ref, o_ref = refs
    else:
        x_ref, w_ref, o_ref = refs
        halo_ref = None

    Cin, M = x_ref.shape[1], x_ref.shape[2]

    x = x_ref[0]                                        # (Cin, M)

    if has_halo:
        halo_top = halo_ref[0, 0]                       # (Cin, W)
        halo_bot = halo_ref[0, 1]
    else:  # single H tile: the rows outside the image are the zero padding
        halo_top = jnp.zeros((Cin, W), x.dtype)
        halo_bot = jnp.zeros((Cin, W), x.dtype)

    # -- horizontal neighbours: shift +-1 along the flattened m = h*W + w axis
    #    (static slice + concat; the wrapped column is masked to the zero pad).
    col = lax.broadcasted_iota(jnp.int32, (1, M), 1) % W
    xm1 = jnp.concatenate([x[:, :1], x[:, :M - 1]], axis=1)    # value at m-1
    xp1 = jnp.concatenate([x[:, 1:], x[:, M - 1:]], axis=1)    # value at m+1
    left_src = jnp.where(col != 0, xm1, 0.0).astype(x.dtype)       # x[h, w-1]
    right_src = jnp.where(col != W - 1, xp1, 0.0).astype(x.dtype)  # x[h, w+1]

    # -- vertical neighbours: splice the halo row (zeros at the image border)
    #    in front of / behind the tile rows.  No accumulator sub-slice RMWs.
    if M > W:
        top_src = jnp.concatenate([halo_top, x[:, :M - W]], axis=1)  # x[h-1, w]
        bot_src = jnp.concatenate([x[:, W:], halo_bot], axis=1)      # x[h+1, w]
    else:  # degenerate single-row tile
        top_src, bot_src = halo_top, halo_bot

    if fuse:
        # Single K = 5*Cin matmul: better MXU fill for small Cin, one
        # accumulation chain, one output store.
        ops = jnp.concatenate([top_src, left_src, x, right_src, bot_src], axis=0)
        out = lax.dot_general(w_ref[...], ops, (((1,), (0,)), ((), ())),
                              preferred_element_type=jnp.float32)
    else:
        def mm(wt, a):
            return lax.dot_general(wt, a, (((1,), (0,)), ((), ())),
                                   preferred_element_type=jnp.float32)
        out = (mm(w_ref[2], x)
               + mm(w_ref[0], top_src) + mm(w_ref[1], left_src)
               + mm(w_ref[3], right_src) + mm(w_ref[4], bot_src))

    o_ref[0] = out.astype(o_ref.dtype)                  # single lane-dense store


# ----------------------------------------------------------------------------
# Tiling helpers.
# ----------------------------------------------------------------------------
def _vmem_capacity_bytes():
    try:
        info = pltpu.get_tpu_info()
        cap = int(getattr(info, "vmem_capacity_bytes", 0))
        if cap > 0:
            return cap
    except Exception:
        pass
    # Conservative fallback (v7x-sized VMEM); also used off-TPU / interpret.
    return 64 * 1024 * 1024


def _valid_tile_rows(H, W):
    # The flattened block's last dim (TH*W) must be a multiple of 128 unless it
    # spans the full H*W axis.
    return [th for th in range(1, H + 1)
            if H % th == 0 and (th == H or (th * W) % 128 == 0)]


def _pick_tile_rows(H, W, Cin, Cout, budget_bytes, itemsize, batch):
    cands = _valid_tile_rows(H, W)                   # always contains H

    def need(th):
        m = th * W
        blocks = 2 * m * (Cin + Cout) * itemsize     # double-buffered in/out blocks
        temps = m * (9 * Cin + 2 * Cout) * 4         # shifted/stacked operands + f32 partials
        return blocks + temps

    fitting = [th for th in cands if need(th) <= budget_bytes]
    th = max(fitting) if fitting else min(cands)
    # Keep at least 2 grid steps so both v7x TensorCores get work.
    if batch * (H // th) < 2:
        smaller = [t for t in fitting if t < th]
        if smaller:
            th = max(smaller)
    return th
    # TODO(synk): support H not divisible by any VMEM-friendly tile via a
    # masked partial last tile instead of falling back to a single full tile.


# ----------------------------------------------------------------------------
# Wrapper.
# ----------------------------------------------------------------------------
def conv2d_hori_veri_cross(x_nchw, weight, theta=0.7, *,
                           tile_rows=None, compute_dtype=None):
    """Forward pass of Conv2d_Hori_Veri_Cross.

    x_nchw : (N, Cin, H, W) float32
    weight : (Cout, Cin, 1, 5) float32  (nn.Conv2d(1,5) weight, bias=False)
    compute_dtype : e.g. jnp.bfloat16 on v6e/v7x (halves HBM/VMEM traffic;
                    accumulation and output stay f32).  Default: float32.
    returns: (N, Cout, H, W) float32
    """
    N, Cin, H, W = x_nchw.shape
    Cout = weight.shape[0]
    assert weight.shape == (Cout, Cin, 1, 5)

    in_dtype = (jnp.dtype(compute_dtype) if compute_dtype is not None
                else jnp.dtype(jnp.float32))

    # ---- 5 cross taps; theta * (1x1 diff conv) folded into the centre tap.
    w32 = weight.astype(jnp.float32)
    taps = [w32[:, :, 0, t] for t in range(5)]                   # (Cout, Cin) each
    centre = taps[2] - theta * (taps[0] + taps[1] + taps[2] + taps[3] + taps[4])
    taps = [taps[0], taps[1], centre, taps[3], taps[4]]          # [top,left,c',right,bottom]

    fuse = Cin <= 32                                             # K-axis tap fusion
    if fuse:
        w_in = jnp.concatenate(taps, axis=1).astype(in_dtype)    # (Cout, 5*Cin)
        w_spec = pl.BlockSpec((Cout, 5 * Cin), lambda n, i: (0, 0))
    else:
        w_in = jnp.stack(taps, axis=0).astype(in_dtype)          # (5, Cout, Cin)
        w_spec = pl.BlockSpec((5, Cout, Cin), lambda n, i: (0, 0, 0))

    # ---- per-generation VMEM budgeting (v5e/v6e: 128 MiB, v7x: 64 MiB).
    vmem_cap = _vmem_capacity_bytes()
    budget = min(vmem_cap // 3, 48 * 1024 * 1024)
    vmem_limit = int(min(vmem_cap * 3 // 4, 96 * 1024 * 1024))

    if tile_rows is None:
        TH = _pick_tile_rows(H, W, Cin, Cout, budget, in_dtype.itemsize, N)
    else:
        TH = int(tile_rows)
        assert H % TH == 0, "tile_rows must divide H"
        assert TH == H or (TH * W) % 128 == 0, \
            "tile_rows * W must be a multiple of 128 (or tile_rows == H)"
    nH = H // TH
    M = TH * W
    has_halo = nH > 1

    # ---- NCHW kept; H and W merged into one lane-dense axis (free reshape,
    #      no HBM transpose passes).
    x_flat = x_nchw.reshape(N, Cin, H * W).astype(in_dtype)

    inputs = [x_flat]
    in_specs = [pl.BlockSpec((1, Cin, M), lambda n, i: (n, 0, i))]

    if has_halo:
        # Row just above / below every H tile (zeros at the image border):
        # a cheap strided gather of 2*(nH-1) rows, not a full jnp.pad pass.
        xi = x_nchw.astype(in_dtype)
        zrow = jnp.zeros((N, Cin, 1, W), in_dtype)
        tops = jnp.concatenate([zrow, xi[:, :, TH - 1:H - 1:TH, :]], axis=2)  # (N,Cin,nH,W)
        bots = jnp.concatenate([xi[:, :, TH:H:TH, :], zrow], axis=2)          # (N,Cin,nH,W)
        halo = jnp.stack([tops, bots], axis=3)                                # (N,Cin,nH,2,W)
        halo = jnp.transpose(halo, (0, 2, 3, 1, 4)).reshape(N, 2 * nH, Cin, W)
        inputs.append(halo)
        in_specs.append(pl.BlockSpec((1, 2, Cin, W), lambda n, i: (n, i, 0, 0)))

    inputs.append(w_in)
    in_specs.append(w_spec)

    out_flat = pl.pallas_call(
        partial(_cross_conv_kernel, W=W, has_halo=has_halo, fuse=fuse),
        out_shape=jax.ShapeDtypeStruct((N, Cout, H * W), jnp.float32),
        grid_spec=pltpu.PrefetchScalarGridSpec(
            num_scalar_prefetch=0,
            grid=(N, nH),
            in_specs=in_specs,
            out_specs=pl.BlockSpec((1, Cout, M), lambda n, i: (n, 0, i)),
        ),
        compiler_params=pltpu.CompilerParams(
            dimension_semantics=("parallel", "parallel"),
            vmem_limit_bytes=vmem_limit),
    )(*inputs)

    return out_flat.reshape(N, Cout, H, W)


# ----------------------------------------------------------------------------
# Pure-JAX reference that mirrors the PyTorch forward literally.
# ----------------------------------------------------------------------------
def _reference(x_nchw, weight, theta=0.7):
    Cout, Cin, _, _ = weight.shape
    zeros = jnp.zeros((Cout, Cin), weight.dtype)
    taps = [zeros, weight[:, :, 0, 0], zeros,
            weight[:, :, 0, 1], weight[:, :, 0, 2], weight[:, :, 0, 3],
            zeros, weight[:, :, 0, 4], zeros]
    conv_weight = jnp.stack(taps, axis=-1).reshape(Cout, Cin, 3, 3)
    dn = ('NCHW', 'OIHW', 'NCHW')
    out_normal = lax.conv_general_dilated(
        x_nchw, conv_weight, window_strides=(1, 1),
        padding=((1, 1), (1, 1)), dimension_numbers=dn,
        precision=lax.Precision.HIGHEST)
    kernel_diff = weight.sum(axis=(2, 3))[:, :, None, None]
    out_diff = lax.conv_general_dilated(
        x_nchw, kernel_diff, window_strides=(1, 1),
        padding='VALID', dimension_numbers=dn,
        precision=lax.Precision.HIGHEST)
    return out_normal - theta * out_diff


if __name__ == "__main__":
    key = jax.random.PRNGKey(0)
    k_x, k_w = jax.random.split(key)

    N, Cin, Cout, H, W = 2, 4, 8, 16, 16
    theta = 0.7

    x = jax.random.normal(k_x, (N, Cin, H, W), dtype=jnp.float32)
    weight = jax.random.normal(k_w, (Cout, Cin, 1, 5), dtype=jnp.float32) * 0.1

    ref = _reference(x, weight, theta=theta)

    # default tiling: a single lane-dense (Cin, H*W) tile per batch element
    out = jax.block_until_ready(conv2d_hori_veri_cross(x, weight, theta=theta))
    np.testing.assert_allclose(np.asarray(out), np.asarray(ref),
                               rtol=1e-3, atol=1e-3)

    # forced multi-tile path exercises the halo splicing (TH*W = 128 per tile)
    out_tiled = jax.block_until_ready(
        conv2d_hori_veri_cross(x, weight, theta=theta, tile_rows=8))
    np.testing.assert_allclose(np.asarray(out_tiled), np.asarray(ref),
                               rtol=1e-3, atol=1e-3)

    print("KERNEL_OK")
</pallas_src>

<mosaic_0001>
module attributes {stable_mosaic.version = 11 : i64} {
  func.func @_cross_conv_kernel(%arg0: i32, %arg1: i32, %arg2: memref<1x4x256xf32, #tpu.memory_space<vmem>>, %arg3: memref<8x20xf32, #tpu.memory_space<vmem>>, %arg4: memref<1x8x256xf32, #tpu.memory_space<vmem>>) attributes {dimension_semantics = [#tpu.dimension_semantics<parallel>, #tpu.dimension_semantics<parallel>], iteration_bounds = array<i64: 2, 1>, scalar_prefetch = 0 : i64, scratch_operands = 0 : i64, tpu.core_type = #tpu.core_type<tc>, window_params = [{transform_indices = @transform_0, window_bounds = array<i64: 1, 4, 256>}, {pipeline_mode = #tpu.pipeline_mode<synchronous>, transform_indices = @transform_1, window_bounds = array<i64: 8, 20>}, {transform_indices = @transform_2, window_bounds = array<i64: 1, 8, 256>}]} {
    %c0 = arith.constant 0 : index
    %c0_0 = arith.constant 0 : index
    %c0_1 = arith.constant 0 : index
    %0 = vector.load %arg2[%c0, %c0_0, %c0_1] : memref<1x4x256xf32, #tpu.memory_space<vmem>>, vector<1x4x256xf32>
    %1 = vector.shape_cast %0 : vector<1x4x256xf32> to vector<4x256xf32>
    %cst = arith.constant 0.000000e+00 : f32
    %2 = vector.broadcast %cst : f32 to vector<4x16xf32>
    %cst_2 = arith.constant 0.000000e+00 : f32
    %3 = vector.broadcast %cst_2 : f32 to vector<4x16xf32>
    %4 = tpu.iota {dimensions = array<i32: 1>} : vector<1x256xi32>
    %c16_i32 = arith.constant 16 : i32
    %c0_i32 = arith.constant 0 : i32
    %5 = arith.cmpi eq, %c16_i32, %c0_i32 : i32
    %c1_i32 = arith.constant 1 : i32
    %6 = arith.select %5, %c1_i32, %c16_i32 : i32
    %7 = vector.broadcast %6 : i32 to vector<1x256xi32>
    %8 = arith.remsi %4, %7 : vector<1x256xi32>
    %c0_i32_3 = arith.constant 0 : i32
    %9 = vector.broadcast %c0_i32_3 : i32 to vector<1x256xi32>
    %10 = arith.cmpi ne, %8, %9 : vector<1x256xi32>
    %c0_i32_4 = arith.constant 0 : i32
    %11 = vector.broadcast %c0_i32_4 : i32 to vector<1x256xi32>
    %12 = arith.cmpi slt, %8, %11 : vector<1x256xi32>
    %c0_i32_5 = arith.constant 0 : i32
    %13 = arith.cmpi slt, %6, %c0_i32_5 : i32
    %14 = vector.broadcast %13 : i1 to vector<1x256xi1>
    %15 = vector.broadcast %14 : vector<1x256xi1> to vector<1x256xi1>
    %16 = arith.xori %12, %15 : vector<1x256xi1>
    %17 = arith.andi %16, %10 : vector<1x256xi1>
    %18 = vector.broadcast %6 : i32 to vector<1x256xi32>
    %19 = arith.addi %8, %18 : vector<1x256xi32>
    %20 = arith.select %17, %19, %8 : vector<1x256xi1>, vector<1x256xi32>
    %21 = vector.extract_strided_slice %1 {offsets = [0, 0], sizes = [4, 1], strides = [1, 1]} : vector<4x256xf32> to vector<4x1xf32>
    %22 = vector.extract_strided_slice %1 {offsets = [0, 0], sizes = [4, 255], strides = [1, 1]} : vector<4x256xf32> to vector<4x255xf32>
    %23 = tpu.concatenate %21, %22 in 1 : vector<4x1xf32>, vector<4x255xf32> -> vector<4x256xf32>
    %24 = vector.extract_strided_slice %1 {offsets = [0, 1], sizes = [4, 255], strides = [1, 1]} : vector<4x256xf32> to vector<4x255xf32>
    %25 = vector.extract_strided_slice %1 {offsets = [0, 255], sizes = [4, 1], strides = [1, 1]} : vector<4x256xf32> to vector<4x1xf32>
    %26 = tpu.concatenate %24, %25 in 1 : vector<4x255xf32>, vector<4x1xf32> -> vector<4x256xf32>
    %c0_i32_6 = arith.constant 0 : i32
    %27 = vector.broadcast %c0_i32_6 : i32 to vector<1x256xi32>
    %28 = arith.cmpi ne, %20, %27 : vector<1x256xi32>
    %cst_7 = arith.constant 0.000000e+00 : f32
    %29 = vector.shape_cast %28 : vector<1x256xi1> to vector<1x256xi1>
    %30 = vector.broadcast %29 : vector<1x256xi1> to vector<4x256xi1>
    %31 = vector.broadcast %cst_7 : f32 to vector<4x256xf32>
    %32 = arith.select %30, %23, %31 : vector<4x256xi1>, vector<4x256xf32>
    %c15_i32 = arith.constant 15 : i32
    %33 = vector.broadcast %c15_i32 : i32 to vector<1x256xi32>
    %34 = arith.cmpi ne, %20, %33 : vector<1x256xi32>
    %cst_8 = arith.constant 0.000000e+00 : f32
    %35 = vector.shape_cast %34 : vector<1x256xi1> to vector<1x256xi1>
    %36 = vector.broadcast %35 : vector<1x256xi1> to vector<4x256xi1>
    %37 = vector.broadcast %cst_8 : f32 to vector<4x256xf32>
    %38 = arith.select %36, %26, %37 : vector<4x256xi1>, vector<4x256xf32>
    %39 = vector.extract_strided_slice %1 {offsets = [0, 0], sizes = [4, 240], strides = [1, 1]} : vector<4x256xf32> to vector<4x240xf32>
    %40 = tpu.concatenate %2, %39 in 1 : vector<4x16xf32>, vector<4x240xf32> -> vector<4x256xf32>
    %41 = vector.extract_strided_slice %1 {offsets = [0, 16], sizes = [4, 240], strides = [1, 1]} : vector<4x256xf32> to vector<4x240xf32>
    %42 = tpu.concatenate %41, %3 in 1 : vector<4x240xf32>, vector<4x16xf32> -> vector<4x256xf32>
    %43 = tpu.concatenate %40, %32, %1, %38, %42 in 0 : vector<4x256xf32>, vector<4x256xf32>, vector<4x256xf32>, vector<4x256xf32>, vector<4x256xf32> -> vector<20x256xf32>
    %c0_9 = arith.constant 0 : index
    %c0_10 = arith.constant 0 : index
    %44 = vector.load %arg3[%c0_9, %c0_10] : memref<8x20xf32, #tpu.memory_space<vmem>>, vector<8x20xf32>
    %cst_11 = arith.constant dense<0.000000e+00> : vector<8x256xf32>
    %45 = tpu.matmul %44, %43, %cst_11 {dimension_numbers = #tpu.dot_dimension_numbers<[1], [0], [0], [1], [0, 0, 1, 1], [], []>} : vector<8x20xf32>, vector<20x256xf32>, vector<8x256xf32> -> vector<8x256xf32>
    %c0_12 = arith.constant 0 : index
    %c0_13 = arith.constant 0 : index
    %c0_14 = arith.constant 0 : index
    %46 = vector.load %arg4[%c0_12, %c0_13, %c0_14] : memref<1x8x256xf32, #tpu.memory_space<vmem>>, vector<1x8x256xf32>
    %47 = vector.shape_cast %46 : vector<1x8x256xf32> to vector<8x256xf32>
    %48 = vector.shape_cast %45 : vector<8x256xf32> to vector<1x8x256xf32>
    tpu.vector_store %arg4[%c0_12, %c0_13, %c0_14], %48 {strides = array<i32>} : memref<1x8x256xf32, #tpu.memory_space<vmem>>, vector<1x8x256xf32>,
    return
  }
  func.func @transform_0(%arg0: i32, %arg1: i32) -> (i32, i32, i32) {
    %c0_i32 = arith.constant 0 : i32
    %c0_i32_0 = arith.constant 0 : i32
    return %arg0, %c0_i32, %arg1 : i32, i32, i32
  }
  func.func @transform_1(%arg0: i32, %arg1: i32) -> (i32, i32) {
    %c0_i32 = arith.constant 0 : i32
    %c0_i32_0 = arith.constant 0 : i32
    %c0_i32_1 = arith.constant 0 : i32
    return %c0_i32, %c0_i32_0 : i32, i32
  }
  func.func @transform_2(%arg0: i32, %arg1: i32) -> (i32, i32, i32) {
    %c0_i32 = arith.constant 0 : i32
    %c0_i32_0 = arith.constant 0 : i32
    return %arg0, %c0_i32, %arg1 : i32, i32, i32
  }
}

</mosaic_0001>

<bundles_post_ra>
// kernel: tpu_custom_call.1
= control target key start
LH: loop header
LB: loop body
LE: loop exit
PB: predicated region body
PF: predicated region fallthrough
CT: control target
= control target key end

     0   :  { %7 = vsyncpa [#allocation3], 0  ;;  %s932_s0 = inlined_call_operand.hbm [shape: f32[2,4,256], index: 0, kind: input, shape index: {}]   ;;  %s933_s1 = inlined_call_operand.hbm [shape: f32[8,20], index: 1, kind: input, shape index: {}]   ;;  %s934_s2 = inlined_call_operand.hbm [shape: f32[2,8,256], index: 2, kind: output, shape index: {}]  }
   0x1   :  { %9 = vsyncpa [#allocation3 + $0x1], 0 }
   0x2   :  { %10 = vsyncpa [#allocation6], 0 }
   0x3   :  { %11 = vsyncpa [#allocation4], 0 }
   0x4   :  { %13 = vsyncpa [#allocation4 + $0x1], 0  ;;  %s750_s9 = smov 0   ;;  %s752_s10 = smov 0  }
   0x5   :  { %s754_s11 = smov 0   ;;  %s756_s12 = smov 0  }
   0x6   :  { %s758_s13 = smov 0   ;;  %s760_s14 = smov 0  }
   0x7 LB: > { %s486_s15 = sadd.s32 4294967295, %s725_s14   ;;  %s487_s16 = sadd.s32 4294967294, %s725_s14   ;;  %s725_s14 = sphi %s760_s14, %s19_s14   ;;  %s721_s13 = sphi %s758_s13, %s953_s13   ;;  %s717_s12 = sphi %s756_s12, %s952_s12   ;;  %s713_s11 = sphi %s754_s11, %s951_s11   ;;  %s709_s10 = sphi %s752_s10, %s950_s10   ;;  %s705_s9 = sphi %s750_s9, %s949_s9  }
   0x8   : > { %p53_p0 = scmp.ne.s32.totalorder %s709_s10, %s705_s9  ;;  %p784_p1 = scmp.eq.s32.totalorder %s486_s15, 0 }
   0x9   : > { %p788_p2 = scmp.eq.s32.totalorder %s486_s15, 1  ;;  %p106_p3 = scmp.eq.s32.totalorder %s487_s16, 1 }
   0xa   : > { %p794_p4 = por %p784_p1, %p53_p0  ;;  %p488_p5 = scmp.ge.s32.totalorder %s725_s14, 1 }
   0xb   : > { %p799_p6 = por %p106_p3, %p53_p0  ;;  %p113_p7 = scmp.lt.s32.totalorder %s725_s14, 3 }
   0xc   : > { %s938_s19 = scalar_select %p794_p4, 1, 0 }
   0xd   : > { %s939_s20 = scalar_select %p799_p6, 1, 0 }
   0xe   : > { %p804_p8 = pnand %p488_p5, %p113_p7  ;;  %s727_s22 = smov [#allocation5]  }
   0xf   : > { %s126_s23 = sshll.u32 %s727_s22, 4  ;;  %s31_s25 = sadd.s32 1, %s721_s13  ;;  %s127_s23 = int_to_ptr.vmem [resolvable:$true] %s126_s23 }
  0x10   : > { %p516_p10 = pneg %p804_p8  ;;  %s40_s26 = sadd.s32 1, %s713_s11 }
  0x11   : > { %p33_p12 = scmp.ge.s32.totalorder %s31_s25, 2  ;;  %s598_s27 = scalar_lea.vmem %s127_s23, 128 }
  0x12   : > { %p813_p11 = pnand %p516_p10, %p784_p1  ;;  %p599_p0 = scmp.ne.s32.totalorder %s127_s23, %s598_s27 }
  0x13   : > { %p606_p7 = scmp.lt.s32.totalorder %s127_s23, %s127_s23  ;;  %p607_p6 = scmp.lt.s32.totalorder %s598_s27, %s598_s27 }
  0x14   : > { %p589_p13 = pneg %p813_p11 }
  0x15   : > { %p608_p9 = por %p607_p6, %p606_p7 }
  0x16   : > { %p601_p3 = pnand %p599_p0, %p589_p13 }
  0x18   : > { %p602_p5 = pneg %p601_p3 }
  0x1a   : > { %p609_p4 = pnand %p608_p9, %p602_p5 }
  0x1c   : > { %612 = shalt.err (!%p609_p4)
}
  0x1d   : > { %519 = dma.hbm_to_vmem [thread:$0]  (!%p813_p11), %s933_s1, 128, %s127_s23, [#allocation6]  }
  0x1e   : > { %s955_s25 = smov (%p33_p12, %s31_s25), 0  ;;  %p47_p6 = scmp.ne.s32.totalorder %s713_s11, %s709_s10 }
  0x1f   : > { %p48_p4 = scmp.eq.s32.totalorder %s725_s14, 0  ;;  %s35_s30 = ssub.s32 %s721_s13, %s955_s25 }
  0x20   : > { %p529_p9 = scmp.lt.s32.totalorder %s725_s14, 2  ;;  %p38_p10 = scmp.eq.s32.totalorder %s35_s30, 0 }
  0x21   : > { %p49_p13 = por %p48_p4, %p47_p6  ;;  %p836_p0 = por %p788_p2, %p47_p6 }
  0x22   : > { %s137_s4 = sand.u32 1, %s713_s11   ;;  %s506_s7 = sshll.u32 %s721_s13, 7 }
  0x23   : > { %s842_s5 = scalar_select %p38_p10, %s713_s11, %s40_s26  }
  0x24   : > { %s491_s6 = sshll.u32 %s137_s4, 3  ;;  %s149_s16 = scalar_lea.hbm %s932_s0, %s506_s7 }
  0x25   : > { %s141_s22 = scalar_lea.vmem [#allocation2], %s491_s6  ;;  %p848_p11 = pnand %p529_p9, %p49_p13 }
  0x26   : > { %s151_s23 = sshll.u32 %s141_s22, 4  ;;  %s138_s18 = scalar_lea.sflag [#allocation3], %s137_s4  ;;  %s152_s23 = int_to_ptr.vmem [resolvable:$true] %s151_s23 }
  0x27   : > { %p615_p2 = pneg %p848_p11  ;;  %s626_s27 = scalar_lea.vmem %s152_s23, 128 }
  0x28   : > { %p627_p12 = scmp.ne.s32.totalorder %s152_s23, %s626_s27  ;;  %s728_s26 = smov [#allocation2]  }
  0x29   : > { %s631_s28 = sshll.u32 %s728_s26, 4  ;;  %s632_s28 = int_to_ptr.vmem [resolvable:$false] %s631_s28 }
  0x2a   : > { %p629_p3 = pnand %p627_p12, %p615_p2  ;;  %s633_s29 = scalar_lea.vmem %s632_s28, 256 }
  0x2b   : > { %p634_p7 = scmp.lt.s32.totalorder %s152_s23, %s632_s28  ;;  %p635_p6 = scmp.lt.s32.totalorder %s633_s29, %s626_s27 }
  0x2c   : > { %p630_p5 = pneg %p629_p3 }
  0x2d   : > { %p636_p4 = por %p635_p6, %p634_p7 }
  0x2f   : > { %p637_p10 = pnand %p636_p4, %p630_p5 }
  0x31   : > { %640 = shalt.err (!%p637_p10)
}
  0x32   : > { %523 = dma.hbm_to_vmem [thread:$0]  (!%p848_p11), %s149_s16, 128, %s152_s23, %s138_s18  }
  0x33   : > { %160 = sbr.rel (%p804_p8) target bundleno = 399 (0x18f), region = 28  ;;  %s859_s30 = sand.u32 (!%p804_p8), 1, %s709_s10  }
  0x34   : > { %s495_s4 = sshll.u32 (!%p804_p8), %s859_s30, 3  ;;  %s163_s6 = scalar_lea.sflag (!%p804_p8), [#allocation3], %s859_s30 }
  0x35   : > { %s166_s7 = scalar_lea.vmem (!%p804_p8), [#allocation2], %s495_s4  ;;  %p944_p9 = scmp.ne.s32.totalorder (!%p804_p8), %s938_s19, 0 }
  0x38   : > { %692 = dma.done.wait (%p944_p9), %s163_s6, 128  }
  0x39   : > { %694 = vsyncadd (%p944_p9), %s163_s6, 4294967168 }
  0x3a   : > { %696 = dma.done.wait (%p784_p1), [#allocation6], 128  }
  0x3b   : > { %698 = vsyncadd (%p784_p1), [#allocation6], 4294967168  ;;  %v193_v0 = vld [vmem:[%s166_s7] sm:$0xff]  ;;  %s729_s21 = smov 1   ;;  %s730_s8 = smov 127   ;;  %v731_v2 = vmov 0.0   ;;  %v194_v3 = vlaneseq }
  0x3c   : > { %223 = vrot.lane.b32.xlu1 %v193_v0, %s729_s21  ;;  %232 = vrot.lane.b32.xlu0 %v193_v0, %s730_s8  ;;  %v222_v1 = vcombine.high %v193_v0, %v193_v0  ;;  %s732_s15 = smov 112   ;;  %s733_s19 = smov 16   ;;  %vm236_vm0 = vcmask 1039360   ;;  %vm227_vm1 = vcmask 7168   ;;  %vm271_vm4 = vcmask 916480   ;;  %v292_v37 = vld [vmem:[#allocation5] sm:$0xff] }
  0x3d   : > { %366 = vmatprep.mubr.f32.mxu0 %v731_v2  ;;  %v195_v4 = vand.u32 127, %v194_v3  ;;  %vm287_vm7 = vcmask 1043456   ;;  %vm262_vm8 = vcmask 130048   ;;  %vm293_vm9 = vcmask 162816   ;;  %s497_s17 = sshll.u32 %s859_s30, 4  ;;  %s507_s23 = sshll.u32 %s717_s12, 8 }
  0x3e   : > { %s190_s16 = scalar_lea.vmem [#allocation7], %s497_s17  ;;  %s390_s27 = scalar_lea.hbm %s934_s2, %s507_s23 }
  0x3f   : > { %v196_v5 = vadd.s32 128, %v195_v4  ;;  %v201_v9 = vand.u32 15, %v195_v4  ;;  %s392_s22 = sshll.u32 %s190_s16, 4  ;;  %s376_s26 = scalar_lea.sflag [#allocation4], %s859_s30  ;;  %s887_s22 = int_to_ptr.vmem [resolvable:$true] %s392_s22 }
  0x40   : > { %267 = vrot.lane.b32.xlu1 %v193_v0, %s732_s15  ;;  %234 = vrot.lane.b32.xlu0 %v222_v1, %s730_s8  ;;  %s641_s28 = scalar_lea.vmem %s887_s22, 256  ;;  %s734_s12 = smov [#allocation7]  }
  0x41   : > { %v208_v6 = vand.u32 15, %v196_v5  ;;  %vm250_vm2 = vcmp.ne.s32.totalorder %v201_v9, 15  ;;  %vm871_vm5 = vcmp.ne.s32.totalorder %v201_v9, 0  ;;  %p642_p1 = scmp.ne.s32.totalorder %s887_s22, %s641_s28  ;;  %s645_s29 = sshll.u32 %s734_s12, 4  ;;  %s646_s29 = int_to_ptr.vmem [resolvable:$false] %s645_s29 }
  0x42   : > { %s647_s4 = scalar_lea.vmem %s646_s29, 512  ;;  %p648_p11 = scmp.lt.s32.totalorder %s887_s22, %s646_s29 }
  0x43   : > { %vm251_vm3 = vcmp.ne.s32.totalorder %v208_v6, 15  ;;  %vm243_vm6 = vcmp.ne.s32.totalorder %v208_v6, 0  ;;  %p643_p8 = pnand %p642_p1, %p836_p0  ;;  %p649_p2 = scmp.lt.s32.totalorder %s647_s4, %s641_s28 }
  0x44   : > { %225 = vrot.lane.b32.xlu1 %v222_v1, %s729_s21  ;;  %269 = vrot.lane.b32.xlu0 %v222_v1, %s732_s15 }
  0x45   : > { %p644_p13 = pneg %p643_p8  ;;  %p650_p12 = por %p649_p2, %p648_p11 }
  0x47   : > { %p651_p3 = pnand %p650_p12, %p644_p13 }
  0x48   : > { %260 = vrot.lane.b32.xlu1 %v222_v1, %s733_s19  ;;  %258 = vrot.lane.b32.xlu0 %v193_v0, %s733_s19 }
  0xae   : > { %v224_v7 = vpop.permute.xlu1 %223  ;;  %v233_v8 = vpop.permute.xlu0 %232 }
  0xaf   : > { %v231_v15 = vsel %vm227_vm1, %v193_v0, %v224_v7 }
  0xb0   : > { %v248_v22 = vsel %vm871_vm5, %v231_v15, 0.0 }
  0xb1   : > { %v277_v29 = vrot.slane %v248_v22, 4 }
  0xb2   : > { %v268_v10 = vpop.permute.xlu1 %267  ;;  %v235_v11 = vpop.permute.xlu0 %234 }
  0xb3   : > { %v237_v12 = vsel %vm236_vm0, %v233_v8, %v235_v11  ;;  %v241_v13 = vsel %vm236_vm0, %v235_v11, %v222_v1 }
  0xb4   : > { %v256_v16 = vsel %vm250_vm2, %v237_v12, 0.0  ;;  %v257_v17 = vsel %vm251_vm3, %v241_v13, 0.0 }
  0xb5   : > { %v284_v18 = vrot.slane %v257_v17, 4  ;;  %v283_v19 = vrot.slane %v256_v16, 4 }
  0xb6   : > { %v226_v20 = vpop.permute.xlu1 %225  ;;  %v270_v21 = vpop.permute.xlu0 %269 }
  0xb7   : > { %v228_v23 = vsel %vm227_vm1, %v224_v7, %v226_v20  ;;  %v274_v24 = vsel %vm271_vm4, %v270_v21, 0.0  ;;  %v272_v25 = vsel %vm271_vm4, %v268_v10, %v270_v21  ;;  %v291_v28 = vsel %vm287_vm7, %v222_v1, %v284_v18 }
  0xb8   : > { %v249_v26 = vsel %vm243_vm6, %v228_v23, 0.0  ;;  %498 = vmatprep.subr.msk.mxu0 %vm287_vm7, %v274_v24  ;;  %v290_v32 = vsel %vm287_vm7, %v193_v0, %v283_v19 }
  0xb9   : > { %v278_v27 = vrot.slane %v249_v26, 4  ;;  %499 = vmatpush1.msk.msra.mxu0 %vm287_vm7, %v272_v25 }
  0xba   : > { %v261_v30 = vpop.permute.xlu1 %260  ;;  %330 = vmatprep.subr.mxu0 %v291_v28  ;;  %v259_v31 = vpop.permute.xlu0 %258 }
  0xbb   : > { %v263_v33 = vsel %vm262_vm8, %v259_v31, %v261_v30  ;;  %v266_v34 = vsel %vm262_vm8, 0.0, %v259_v31  ;;  %331 = vmatpush1.msra.mxu0 %v290_v32 }
  0xbc   : > { %v289_v35 = vsel %vm287_vm7, %v263_v33, %v278_v27  ;;  %v288_v36 = vsel %vm287_vm7, %v266_v34, %v277_v29 }
  0xbd   : > { %332 = vmatprep.subr.mxu0 %v289_v35 }
  0xbe   : > { %333 = vmatpush1.msra.mxu0 %v288_v36 }
  0xbf   : > { %500 = vmatmul.mubr.msk.f32.vlgmr.msra.gmra.mxu0 %vm293_vm9, %v292_v37 }
 0x17f   : > { %v368_v38 = vpop.f32.mrf.mxu0 }
 0x180   : > { %373 = vst [vmem:[%s190_s16] sm:$0xff] %v368_v38 }
 0x181   : > { %v370_v39 = vpop.f32.mrf.mxu0 }
 0x182   : > { %374 = vst [vmem:[%s190_s16 + $0x8] sm:$0xff] %v370_v39 }
 0x183   : > { %654 = shalt.err (!%p651_p3)
}
 0x184   : > { %s655_s6 = scalar_lea.hbm %s390_s27, 256  ;;  %s659_s21 = scalar_lea.hbm %s934_s2, 512 }
 0x185   : > { %p656_p5 = scmp.ne.s32.totalorder %s390_s27, %s655_s6  ;;  %p660_p4 = scmp.lt.s32.totalorder %s390_s27, %s934_s2 }
 0x186   : > { %p661_p10 = scmp.lt.s32.totalorder %s659_s21, %s655_s6 }
 0x187   : > { %p657_p7 = pnand %p656_p5, %p836_p0 }
 0x188   : > { %p662_p9 = por %p661_p10, %p660_p4 }
 0x189   : > { %p658_p6 = pneg %p657_p7 }
 0x18b   : > { %p663_p1 = pnand %p662_p9, %p658_p6 }
 0x18d   : > { %666 = shalt.err (!%p663_p1)
}
 0x18e   : > { %514 = dma.vmem_to_hbm [thread:$0]  (%p836_p0), %s887_s22, 256, %s390_s27, %s376_s26  }
 0x18f PF: > { %s404_s19 = sand.u32 1, %s705_s9   ;;  %p947_p8 = scmp.ne.s32.totalorder %s939_s20, 0 }
 0x190   : > { %p948_p13 = scmp.ge.s32.totalorder %s725_s14, 2  ;;  %s405_s17 = scalar_lea.sflag [#allocation4], %s404_s19 }
 0x192   : > { %p525_p11 = pnand %p948_p13, %p947_p8 }
 0x194   : > { %p526_p2 = pneg %p525_p11 }
 0x196   : > { %700 = dma.done.wait (%p526_p2), %s405_s17, 256  }
 0x197   : > { %702 = vsyncadd (%p526_p2), %s405_s17, 4294967040  ;;  %s19_s14 = sadd.s32 1, %s725_s14   ;;  %s949_s9 = smov %s709_s10 }
 0x198   : > { %p16_p12 = scmp.ge.s32.totalorder %s19_s14, 4   ;;  %s950_s10 = smov %s713_s11 }
 0x199   : > { %s951_s11 = smov %s842_s5  ;;  %s952_s12 = smov %s721_s13 }
 0x19a   : > { %s953_s13 = smov %s955_s25  ;;  %18 = sbr.rel (!%p16_p12) target bundleno = 7 (0x7), region = 77 }
 0x19f   :  { %410 = vsyncpa [#allocation3], 1 }
 0x1a0   :  { %412 = vsyncpa [#allocation3 + $0x1], 1 }
 0x1a1   :  { %413 = vsyncpa [#allocation6], 1 }
 0x1a2   :  { %414 = vsyncpa [#allocation4], 1 }
 0x1a3   :  { %416 = vsyncpa [#allocation4 + $0x1], 1 }

</bundles_post_ra>
